<compile_context>
chip_gen: v7x
topology: tpu7x:2x2x1
jax: 0.10.0
libtpu: 0.0.40
codegen_flags: <defaults>
</compile_context>

<pallas_src>
import math

import jax
import jax.numpy as jnp
from jax.experimental import pallas as pl
from jax.experimental.pallas import tpu as pltpu


# ---------------------------------------------------------------------------
# Pass 1 (recompute mode): MXU matmul, per-channel batch statistics only.
# grid = (channel_block, batch, spatial_tile); stats blocks stay VMEM-resident
# across the inner "arbitrary" spatial-tile axis, partial per batch image.
# ---------------------------------------------------------------------------
def _stats_kernel(p_ref, w_ref, sum_ref, sq_ref):
    st = pl.program_id(2)

    @pl.when(st == 0)
    def _init():
        sum_ref[...] = jnp.zeros_like(sum_ref)
        sq_ref[...] = jnp.zeros_like(sq_ref)

    y = jnp.dot(p_ref[...], w_ref[...], preferred_element_type=jnp.float32)
    # Zero-padded spatial rows / channels contribute nothing to the sums.
    sum_ref[...] += jnp.sum(y, axis=0, keepdims=True)
    sq_ref[...] += jnp.sum(y * y, axis=0, keepdims=True)


# ---------------------------------------------------------------------------
# Pass 1 (store mode): same, but also stream the conv result out (compute
# dtype, not f32) for pass 2 to re-read.
# ---------------------------------------------------------------------------
def _conv_stats_kernel(p_ref, w_ref, conv_ref, sum_ref, sq_ref):
    st = pl.program_id(2)

    @pl.when(st == 0)
    def _init():
        sum_ref[...] = jnp.zeros_like(sum_ref)
        sq_ref[...] = jnp.zeros_like(sq_ref)

    y = jnp.dot(p_ref[...], w_ref[...], preferred_element_type=jnp.float32)
    conv_ref[...] = y.astype(conv_ref.dtype)
    sum_ref[...] += jnp.sum(y, axis=0, keepdims=True)
    sq_ref[...] += jnp.sum(y * y, axis=0, keepdims=True)


# ---------------------------------------------------------------------------
# Pass 2 (recompute mode): matmul + fused BN affine + ReLU, transposed tile
# write -> output laid out (N, C_pad, S_pad) so no XLA transpose is needed.
# ---------------------------------------------------------------------------
def _matmul_bn_relu_kernel(p_ref, w_ref, scale_ref, shift_ref, o_ref):
    y = jnp.dot(p_ref[...], w_ref[...], preferred_element_type=jnp.float32)
    y = jnp.maximum(y * scale_ref[...] + shift_ref[...], 0.0)
    o_ref[...] = y.T.astype(o_ref.dtype)          # (TN, TM) tile, XLU transpose


# ---------------------------------------------------------------------------
# Pass 2 (store mode): BN affine + ReLU on the stored compute-dtype conv.
# ---------------------------------------------------------------------------
def _bn_relu_kernel(conv_ref, scale_ref, shift_ref, o_ref):
    y = conv_ref[...].astype(jnp.float32)
    y = jnp.maximum(y * scale_ref[...] + shift_ref[...], 0.0)
    o_ref[...] = y.T.astype(o_ref.dtype)


def _round_up(a, b):
    return ((a + b - 1) // b) * b


def _hw_params():
    """Generation-aware MXU width / VMEM budget (defensive: safe fallbacks)."""
    mxu_wide = False                      # 256-wide MXU (v6e / v7x)
    vmem_cap = 64 * 1024 * 1024           # conservative default (v7x per-TC)
    try:
        kind = jax.devices()[0].device_kind.lower()
        mxu_wide = ("v6" in kind) or ("v7" in kind) or ("7x" in kind)
    except Exception:
        pass
    try:
        info = pltpu.get_tpu_info()
        vmem_cap = int(getattr(info, "vmem_capacity_bytes", vmem_cap))
    except Exception:
        pass
    vmem_limit = min(max((vmem_cap * 3) // 4, 32 * 1024 * 1024),
                     100 * 1024 * 1024, vmem_cap)
    budget = vmem_limit // 2
    return mxu_wide, vmem_limit, budget


def conv_bn_relu(x, w, gamma, beta, *, stride=1, padding=0, dilation=1, eps=1e-5,
                 compute_dtype=jnp.bfloat16, mode="auto"):
    """x: (N, C_in, H, W) NCHW; w: (C_out, C_in, KH, KW); gamma/beta: (C_out,).

    mode: "auto" | "recompute" (no intermediate) | "store" (compute-dtype conv).
    """
    N, C_in, H, W = x.shape
    C_out, _, KH, KW = w.shape
    H_out = (H + 2 * padding - dilation * (KH - 1) - 1) // stride + 1
    W_out = (W + 2 * padding - dilation * (KW - 1) - 1) // stride + 1
    S = H_out * W_out
    Kdim = C_in * KH * KW

    mxu_wide, vmem_limit, budget = _hw_params()

    # ---- lane-dense channel padding: TN=256 only on wide-MXU parts & big C_out ----
    TN = 256 if (mxu_wide and C_out > 128) else 128
    C_pad = _round_up(C_out, TN)
    n_cb = C_pad // TN

    if mode == "auto":
        # Re-reading the patches once (recompute) vs write+read of the conv
        # intermediate (compute dtype): cheaper whenever Kdim <= 2 * C_pad.
        mode = "recompute" if Kdim <= 2 * C_pad else "store"

    # ---- spatial row-tile selection against the generation-specific budget ----
    in_bytes = jnp.dtype(compute_dtype).itemsize
    out_bytes = jnp.dtype(x.dtype).itemsize
    TM = 128
    for cand in (512, 256, 128):
        working_set = (2 * cand * Kdim * in_bytes      # double-buffered patch tiles
                       + 2 * Kdim * TN * in_bytes      # double-buffered weight blocks
                       + 2 * cand * TN * in_bytes      # stored-conv tiles (store mode)
                       + 2 * cand * TN * out_bytes     # pass-2 output tiles
                       + 4 * cand * TN                 # f32 matmul result headroom
                       + 16 * TN * 4)                  # stats / scale / shift blocks
        if working_set <= budget:
            TM = cand
            break
    TM = max(128, min(TM, _round_up(S, 128)))          # don't over-pad tiny images
    S_pad = _round_up(S, TM)
    n_st = S_pad // TM

    # ---- glue: cast FIRST (bf16-width im2col stream), zero-pad, im2col ----
    x_c = x.astype(compute_dtype)
    x_pad = jnp.pad(x_c, ((0, 0), (0, 0), (padding, padding), (padding, padding)))
    slabs = []
    for kh in range(KH):
        for kw in range(KW):
            h0, w0 = kh * dilation, kw * dilation
            slab = jax.lax.slice(
                x_pad,
                (0, 0, h0, w0),
                (N, C_in, h0 + (H_out - 1) * stride + 1, w0 + (W_out - 1) * stride + 1),
                (1, 1, stride, stride),
            )  # (N, C_in, H_out, W_out)
            slabs.append(slab)
    patches = jnp.stack(slabs, axis=0).reshape(KH, KW, N, C_in, H_out, W_out)
    patches = patches.transpose(2, 4, 5, 3, 0, 1)              # (N, Ho, Wo, C_in, KH, KW)
    patches = patches.reshape(N, S, Kdim)
    patches = jnp.pad(patches, ((0, 0), (0, S_pad - S), (0, 0)))   # (N, S_pad, Kdim)

    w_mat = w.reshape(C_out, Kdim).T                           # (Kdim, C_out), ci-kh-kw order
    w_mat = jnp.pad(w_mat, ((0, 0), (0, C_pad - C_out))).astype(compute_dtype)

    # ---- pass 1: conv matmul + per-channel (per-batch-image) batch statistics ----
    stats_shape = jax.ShapeDtypeStruct((N, 1, C_pad), jnp.float32)
    stats_spec = pl.BlockSpec((None, 1, TN), lambda cb, n, st: (n, 0, cb))
    patch_spec_p1 = pl.BlockSpec((None, TM, Kdim), lambda cb, n, st: (n, st, 0))
    w_spec_p1 = pl.BlockSpec((Kdim, TN), lambda cb, n, st: (0, cb))
    p1_params = pltpu.CompilerParams(
        dimension_semantics=("parallel", "parallel", "arbitrary"),
        vmem_limit_bytes=vmem_limit)

    conv_store = None
    if mode == "recompute":
        psum, psq = pl.pallas_call(
            _stats_kernel,
            out_shape=(stats_shape, stats_shape),
            grid_spec=pltpu.PrefetchScalarGridSpec(
                num_scalar_prefetch=0,
                grid=(n_cb, N, n_st),
                in_specs=[patch_spec_p1, w_spec_p1],
                out_specs=(stats_spec, stats_spec),
            ),
            compiler_params=p1_params,
        )(patches, w_mat)
    else:
        conv_store, psum, psq = pl.pallas_call(
            _conv_stats_kernel,
            out_shape=(
                jax.ShapeDtypeStruct((N, S_pad, C_pad), compute_dtype),
                stats_shape, stats_shape),
            grid_spec=pltpu.PrefetchScalarGridSpec(
                num_scalar_prefetch=0,
                grid=(n_cb, N, n_st),
                in_specs=[patch_spec_p1, w_spec_p1],
                out_specs=(
                    pl.BlockSpec((None, TM, TN), lambda cb, n, st: (n, st, cb)),
                    stats_spec, stats_spec),
            ),
            compiler_params=p1_params,
        )(patches, w_mat)

    # ---- tiny per-channel BN math in plain JAX (exact BatchNorm2d training fwd) ----
    cnt = float(N * S)                                        # true rows only
    ch_sum = psum.sum(axis=(0, 1))                            # reduce per-image partials
    ch_sq = psq.sum(axis=(0, 1))
    mean = ch_sum / cnt
    # E[y^2] - E[y]^2 in f32, clamped >= 0 (cancellation note: for huge M with
    # |mean| >> std this can lose digits vs a two-pass mean-then-var).
    var = jnp.maximum(ch_sq / cnt - mean * mean, 0.0)
    g_pad = jnp.pad(gamma.astype(jnp.float32), (0, C_pad - C_out))
    b_pad = jnp.pad(beta.astype(jnp.float32), (0, C_pad - C_out))
    scale_v = g_pad * jax.lax.rsqrt(var + eps)
    shift_v = b_pad - mean * scale_v
    scale = scale_v.reshape(1, C_pad)
    shift = shift_v.reshape(1, C_pad)

    # ---- pass 2: fused BN + ReLU, transposed tile writes -> (N, C_pad, S_pad) ----
    out_nc = jax.ShapeDtypeStruct((N, C_pad, S_pad), x.dtype)
    out_spec = pl.BlockSpec((None, TN, TM), lambda n, st, cb: (n, cb, st))
    ss_spec = pl.BlockSpec((1, TN), lambda n, st, cb: (0, cb))
    p2_params = pltpu.CompilerParams(
        dimension_semantics=("parallel", "parallel", "parallel"),
        vmem_limit_bytes=vmem_limit)

    if mode == "recompute":
        out = pl.pallas_call(
            _matmul_bn_relu_kernel,
            out_shape=out_nc,
            grid_spec=pltpu.PrefetchScalarGridSpec(
                num_scalar_prefetch=0,
                grid=(N, n_st, n_cb),                         # cb innermost: patch tile reused
                in_specs=[
                    pl.BlockSpec((None, TM, Kdim), lambda n, st, cb: (n, st, 0)),
                    pl.BlockSpec((Kdim, TN), lambda n, st, cb: (0, cb)),
                    ss_spec, ss_spec],
                out_specs=out_spec,
            ),
            compiler_params=p2_params,
        )(patches, w_mat, scale, shift)
    else:
        out = pl.pallas_call(
            _bn_relu_kernel,
            out_shape=out_nc,
            grid_spec=pltpu.PrefetchScalarGridSpec(
                num_scalar_prefetch=0,
                grid=(N, n_st, n_cb),
                in_specs=[
                    pl.BlockSpec((None, TM, TN), lambda n, st, cb: (n, st, cb)),
                    ss_spec, ss_spec],
                out_specs=out_spec,
            ),
            compiler_params=p2_params,
        )(conv_store, scale, shift)

    # ---- glue: strip padding; reshape is layout-free (no XLA transpose) ----
    out = out[:, :C_out, :S]
    return out.reshape(N, C_out, H_out, W_out)


def _reference(x, w, gamma, beta, *, stride, padding, dilation, eps=1e-5):
    conv = jax.lax.conv_general_dilated(
        x, w,
        window_strides=(stride, stride),
        padding=((padding, padding), (padding, padding)),
        rhs_dilation=(dilation, dilation),
        dimension_numbers=("NCHW", "OIHW", "NCHW"),
    )
    mean = conv.mean(axis=(0, 2, 3), keepdims=True)
    var = conv.var(axis=(0, 2, 3), keepdims=True)             # biased, like BN forward
    y = (conv - mean) / jnp.sqrt(var + eps)
    y = y * gamma.reshape(1, -1, 1, 1) + beta.reshape(1, -1, 1, 1)
    return jnp.maximum(y, 0.0)


if __name__ == "__main__":
    key = jax.random.PRNGKey(0)
    k1, k2, k3, k4 = jax.random.split(key, 4)

    # ConvBNReLU(in_planes=4, out_planes=8, kernel_size=3, stride=1, padding=1)
    N, C_in, H, W = 2, 4, 16, 16
    C_out, KH, KW = 8, 3, 3
    stride, padding, dilation = 1, 1, 1

    x = jax.random.normal(k1, (N, C_in, H, W), dtype=jnp.float32)
    fan_in = C_in * KH * KW
    w = jax.random.normal(k2, (C_out, C_in, KH, KW), dtype=jnp.float32) / math.sqrt(fan_in)
    gamma = 1.0 + 0.1 * jax.random.normal(k3, (C_out,), dtype=jnp.float32)
    beta = 0.1 * jax.random.normal(k4, (C_out,), dtype=jnp.float32)

    ref = _reference(x, w, gamma, beta, stride=stride, padding=padding, dilation=dilation)

    # Exactness: f32 operands, recompute (no-intermediate) path.
    out_f32 = conv_bn_relu(x, w, gamma, beta, stride=stride, padding=padding,
                           dilation=dilation, compute_dtype=jnp.float32)
    out_f32 = jax.block_until_ready(out_f32)
    assert out_f32.shape == ref.shape == (N, C_out, H, W)
    assert jnp.allclose(out_f32, ref, atol=1e-4, rtol=1e-4), "f32 recompute mismatch vs reference"

    # Performance-default path: bf16 MXU operands, f32 accumulation / BN stats.
    out_bf16 = conv_bn_relu(x, w, gamma, beta, stride=stride, padding=padding,
                            dilation=dilation, compute_dtype=jnp.bfloat16)
    out_bf16 = jax.block_until_ready(out_bf16)
    assert jnp.allclose(out_bf16, ref, atol=3e-2, rtol=3e-2), "bf16 mismatch vs reference"

    # Large-Kdim fallback path (stored compute-dtype intermediate).
    out_store = conv_bn_relu(x, w, gamma, beta, stride=stride, padding=padding,
                             dilation=dilation, compute_dtype=jnp.float32, mode="store")
    out_store = jax.block_until_ready(out_store)
    assert jnp.allclose(out_store, ref, atol=1e-4, rtol=1e-4), "store-mode mismatch vs reference"

    # Shape exercising multiple spatial tiles + zero-row padding (S=784 -> S_pad=1024).
    H2 = W2 = 28
    x2 = jax.random.normal(k1, (N, C_in, H2, W2), dtype=jnp.float32)
    ref2 = _reference(x2, w, gamma, beta, stride=stride, padding=padding, dilation=dilation)
    out2 = conv_bn_relu(x2, w, gamma, beta, stride=stride, padding=padding,
                        dilation=dilation, compute_dtype=jnp.float32)
    out2 = jax.block_until_ready(out2)
    assert jnp.allclose(out2, ref2, atol=1e-4, rtol=1e-4), "multi-tile mismatch vs reference"

    print("KERNEL_OK")
</pallas_src>

<mosaic_0001>
module attributes {stable_mosaic.version = 11 : i64} {
  func.func @_stats_kernel(%arg0: i32, %arg1: i32, %arg2: i32, %arg3: memref<1x256x36xf32, #tpu.memory_space<vmem>>, %arg4: memref<36x128xf32, #tpu.memory_space<vmem>>, %arg5: memref<1x1x128xf32, #tpu.memory_space<vmem>>, %arg6: memref<1x1x128xf32, #tpu.memory_space<vmem>>) attributes {dimension_semantics = [#tpu.dimension_semantics<parallel>, #tpu.dimension_semantics<parallel>, #tpu.dimension_semantics<arbitrary>], iteration_bounds = array<i64: 1, 2, 1>, scalar_prefetch = 0 : i64, scratch_operands = 0 : i64, tpu.core_type = #tpu.core_type<tc>, window_params = [{transform_indices = @transform_0, window_bounds = array<i64: 1, 256, 36>}, {transform_indices = @transform_1, window_bounds = array<i64: 36, 128>}, {transform_indices = @transform_2, window_bounds = array<i64: 1, 1, 128>}, {transform_indices = @transform_3, window_bounds = array<i64: 1, 1, 128>}]} {
    %c0_i32 = arith.constant 0 : i32
    %0 = arith.cmpi eq, %arg2, %c0_i32 : i32
    %1 = arith.extui %0 : i1 to i32
    %c0_i32_0 = arith.constant 0 : i32
    %2 = arith.cmpi ne, %1, %c0_i32_0 : i32
    scf.if %2 {
      %cst_19 = arith.constant 0.000000e+00 : f32
      %24 = vector.broadcast %cst_19 : f32 to vector<1x128xf32>
      %c0_20 = arith.constant 0 : index
      %c0_21 = arith.constant 0 : index
      %c0_22 = arith.constant 0 : index
      %25 = vector.load %arg5[%c0_20, %c0_21, %c0_22] : memref<1x1x128xf32, #tpu.memory_space<vmem>>, vector<1x1x128xf32>
      %26 = vector.shape_cast %25 : vector<1x1x128xf32> to vector<1x128xf32>
      %27 = vector.shape_cast %24 : vector<1x128xf32> to vector<1x1x128xf32>
      tpu.vector_store %arg5[%c0_20, %c0_21, %c0_22], %27 {strides = array<i32>} : memref<1x1x128xf32, #tpu.memory_space<vmem>>, vector<1x1x128xf32>,
      %cst_23 = arith.constant 0.000000e+00 : f32
      %28 = vector.broadcast %cst_23 : f32 to vector<1x128xf32>
      %c0_24 = arith.constant 0 : index
      %c0_25 = arith.constant 0 : index
      %c0_26 = arith.constant 0 : index
      %29 = vector.load %arg6[%c0_24, %c0_25, %c0_26] : memref<1x1x128xf32, #tpu.memory_space<vmem>>, vector<1x1x128xf32>
      %30 = vector.shape_cast %29 : vector<1x1x128xf32> to vector<1x128xf32>
      %31 = vector.shape_cast %28 : vector<1x128xf32> to vector<1x1x128xf32>
      tpu.vector_store %arg6[%c0_24, %c0_25, %c0_26], %31 {strides = array<i32>} : memref<1x1x128xf32, #tpu.memory_space<vmem>>, vector<1x1x128xf32>,
    } else {
    }
    %c0 = arith.constant 0 : index
    %c0_1 = arith.constant 0 : index
    %c0_2 = arith.constant 0 : index
    %3 = vector.load %arg3[%c0, %c0_1, %c0_2] : memref<1x256x36xf32, #tpu.memory_space<vmem>>, vector<1x256x36xf32>
    %4 = vector.shape_cast %3 : vector<1x256x36xf32> to vector<256x36xf32>
    %c0_3 = arith.constant 0 : index
    %c0_4 = arith.constant 0 : index
    %5 = vector.load %arg4[%c0_3, %c0_4] : memref<36x128xf32, #tpu.memory_space<vmem>>, vector<36x128xf32>
    %cst = arith.constant dense<0.000000e+00> : vector<256x128xf32>
    %6 = tpu.matmul %4, %5, %cst {dimension_numbers = #tpu.dot_dimension_numbers<[1], [0], [0], [1], [0, 0, 1, 1], [], []>} : vector<256x36xf32>, vector<36x128xf32>, vector<256x128xf32> -> vector<256x128xf32>
    %c0_5 = arith.constant 0 : index
    %c0_6 = arith.constant 0 : index
    %c0_7 = arith.constant 0 : index
    %7 = vector.load %arg5[%c0_5, %c0_6, %c0_7] : memref<1x1x128xf32, #tpu.memory_space<vmem>>, vector<1x1x128xf32>
    %8 = vector.shape_cast %7 : vector<1x1x128xf32> to vector<1x128xf32>
    %cst_8 = arith.constant dense<0.000000e+00> : vector<128xf32>
    %9 = vector.multi_reduction <add>, %6, %cst_8 [0] : vector<256x128xf32> to vector<128xf32>
    %10 = vector.shape_cast %9 : vector<128xf32> to vector<1x128xf32>
    %11 = arith.addf %8, %10 : vector<1x128xf32>
    %c0_9 = arith.constant 0 : index
    %c0_10 = arith.constant 0 : index
    %c0_11 = arith.constant 0 : index
    %12 = vector.load %arg5[%c0_9, %c0_10, %c0_11] : memref<1x1x128xf32, #tpu.memory_space<vmem>>, vector<1x1x128xf32>
    %13 = vector.shape_cast %12 : vector<1x1x128xf32> to vector<1x128xf32>
    %14 = vector.shape_cast %11 : vector<1x128xf32> to vector<1x1x128xf32>
    tpu.vector_store %arg5[%c0_9, %c0_10, %c0_11], %14 {strides = array<i32>} : memref<1x1x128xf32, #tpu.memory_space<vmem>>, vector<1x1x128xf32>,
    %c0_12 = arith.constant 0 : index
    %c0_13 = arith.constant 0 : index
    %c0_14 = arith.constant 0 : index
    %15 = vector.load %arg6[%c0_12, %c0_13, %c0_14] : memref<1x1x128xf32, #tpu.memory_space<vmem>>, vector<1x1x128xf32>
    %16 = vector.shape_cast %15 : vector<1x1x128xf32> to vector<1x128xf32>
    %17 = arith.mulf %6, %6 : vector<256x128xf32>
    %cst_15 = arith.constant dense<0.000000e+00> : vector<128xf32>
    %18 = vector.multi_reduction <add>, %17, %cst_15 [0] : vector<256x128xf32> to vector<128xf32>
    %19 = vector.shape_cast %18 : vector<128xf32> to vector<1x128xf32>
    %20 = arith.addf %16, %19 : vector<1x128xf32>
    %c0_16 = arith.constant 0 : index
    %c0_17 = arith.constant 0 : index
    %c0_18 = arith.constant 0 : index
    %21 = vector.load %arg6[%c0_16, %c0_17, %c0_18] : memref<1x1x128xf32, #tpu.memory_space<vmem>>, vector<1x1x128xf32>
    %22 = vector.shape_cast %21 : vector<1x1x128xf32> to vector<1x128xf32>
    %23 = vector.shape_cast %20 : vector<1x128xf32> to vector<1x1x128xf32>
    tpu.vector_store %arg6[%c0_16, %c0_17, %c0_18], %23 {strides = array<i32>} : memref<1x1x128xf32, #tpu.memory_space<vmem>>, vector<1x1x128xf32>,
    return
  }
  func.func @transform_0(%arg0: i32, %arg1: i32, %arg2: i32) -> (i32, i32, i32) {
    %c0_i32 = arith.constant 0 : i32
    %c0_i32_0 = arith.constant 0 : i32
    return %arg1, %arg2, %c0_i32 : i32, i32, i32
  }
  func.func @transform_1(%arg0: i32, %arg1: i32, %arg2: i32) -> (i32, i32) {
    %c0_i32 = arith.constant 0 : i32
    %c0_i32_0 = arith.constant 0 : i32
    return %c0_i32, %arg0 : i32, i32
  }
  func.func @transform_2(%arg0: i32, %arg1: i32, %arg2: i32) -> (i32, i32, i32) {
    %c0_i32 = arith.constant 0 : i32
    %c0_i32_0 = arith.constant 0 : i32
    return %arg1, %c0_i32, %arg0 : i32, i32, i32
  }
  func.func @transform_3(%arg0: i32, %arg1: i32, %arg2: i32) -> (i32, i32, i32) {
    %c0_i32 = arith.constant 0 : i32
    %c0_i32_0 = arith.constant 0 : i32
    return %arg1, %c0_i32, %arg0 : i32, i32, i32
  }
}

</mosaic_0001>

<bundles_post_ra>
// kernel: tpu_custom_call.1
= control target key start
LH: loop header
LB: loop body
LE: loop exit
PB: predicated region body
PF: predicated region fallthrough
CT: control target
= control target key end

     0   :  { %9 = vsyncpa [#allocation3], 0  ;;  %s1504_s0 = inlined_call_operand.vmem [shape: f32[2,256,36], index: 0, kind: input, shape index: {}]   ;;  %s1505_s1 = inlined_call_operand.vmem [shape: f32[36,128], index: 1, kind: input, shape index: {}]   ;;  %s1506_s2 = inlined_call_operand.hbm [shape: f32[2,1,128], index: 2, kind: output, shape index: {0}]   ;;  %s1507_s3 = inlined_call_operand.hbm [shape: f32[2,1,128], index: 3, kind: output, shape index: {1}]  }
   0x1   :  { %11 = vsyncpa [#allocation3 + $0x1], 0 }
   0x2   :  { %12 = vsyncpa [#allocation5], 0 }
   0x3   :  { %14 = vsyncpa [#allocation5 + $0x1], 0  ;;  %s1215_s12 = smov 0   ;;  %s1217_s13 = smov 0  }
   0x4   :  { %s1219_s14 = smov 0   ;;  %s1221_s15 = smov 0  }
   0x5   :  { %s1223_s16 = smov 0   ;;  %s1225_s17 = smov 0  }
   0x6 LB: > { %s864_s18 = sadd.s32 4294967295, %s1190_s17   ;;  %s865_s19 = sadd.s32 4294967294, %s1190_s17   ;;  %s1190_s17 = sphi %s1225_s17, %s20_s17   ;;  %s1186_s16 = sphi %s1223_s16, %s1514_s16   ;;  %s1182_s15 = sphi %s1221_s15, %s1513_s15   ;;  %s1178_s14 = sphi %s1219_s14, %s1512_s14   ;;  %s1174_s13 = sphi %s1217_s13, %s1511_s13   ;;  %s1170_s12 = sphi %s1215_s12, %s1510_s12  }
   0x7   : > { %s35_s20 = sadd.s32 1, %s1186_s16  ;;  %s102_s21 = sadd.s32 1, %s1178_s14 }
   0x8   : > { %p37_p0 = scmp.ge.s32.totalorder %s35_s20, 2  ;;  %p112_p1 = scmp.ne.s32.totalorder %s1178_s14, %s1174_s13 }
   0x9   : > { %p113_p2 = scmp.eq.s32.totalorder %s864_s18, 1  ;;  %p118_p3 = scmp.ne.s32.totalorder %s1174_s13, %s1170_s12 }
   0xa   : > { %s1516_s20 = smov (%p37_p0, %s35_s20), 0  ;;  %p119_p5 = scmp.eq.s32.totalorder %s865_s19, 1 }
   0xb   : > { %p1255_p4 = por %p113_p2, %p112_p1  ;;  %s97_s23 = ssub.s32 %s1186_s16, %s1516_s20 }
   0xc   : > { %p869_p6 = scmp.ge.s32.totalorder %s1190_s17, 1  ;;  %p100_p7 = scmp.eq.s32.totalorder %s97_s23, 0 }
   0xd   : > { %p1262_p8 = por %p119_p5, %p118_p3  ;;  %p185_p9 = scmp.lt.s32.totalorder %s1190_s17, 3 }
   0xe   : > { %s1268_s25 = scalar_select %p100_p7, %s1178_s14, %s102_s21  }
   0xf   : > { %p186_p10 = pnand %p869_p6, %p185_p9 }
  0x10   : > { %v272_v0 = vld [vmem:[%s1505_s1] sm:$0xff] (!%p186_p10)  ;;  %v273_v1 = vld [vmem:[%s1505_s1 + $0x8] sm:$0xff] (!%p186_p10)  ;;  %v274_v2 = vld [vmem:[%s1505_s1 + $0x10] sm:$0xff] (!%p186_p10)  ;;  %p221_p11 = scmp.lt.s32.totalorder (!%p186_p10), %s1182_s15, 1  ;;  %vm277_vm0 = vcmask (!%p186_p10), 293888   ;;  %vm374_vm1 = vcmask (!%p186_p10), 1043456  }
  0x11   : > { %189 = sbr.rel (%p186_p10) target bundleno = 358 (0x166), region = 28  ;;  %v1005_v3 = vpack.c.bf16 (!%p186_p10), %v273_v1, %v272_v0  ;;  %v275_v4 = vld [vmem:[%s1505_s1 + $0x18] sm:$0xff] (!%p186_p10)  ;;  %v276_v6 = vld [vmem:[%s1505_s1 + $0x20] sm:$0xf] (!%p186_p10)  ;;  %s1357_s21 = sand.u32 (!%p186_p10), 1, %s1174_s13   ;;  %v1192_v39 = vmov (!%p186_p10), 0.0  }
  0x12   : > { %v1009_v5 = vpack.c.bf16 (!%p186_p10), %v275_v4, %v274_v2  ;;  %s1360_s23 = scalar_lea.vmem (!%p186_p10), [#allocation2], %s1357_s21  ;;  %s1364_s26 = scalar_lea.vmem (!%p186_p10), [#allocation4], %s1357_s21 }
  0x13   : > { %1006 = vmatprep.subr.bf16.mxu0 (!%p186_p10), %v1005_v3  ;;  %1013 = vmatprep.subr.bf16.mxu1 (!%p186_p10), %v1005_v3  ;;  %238 = vst [vmem:[%s1360_s23] sm:$0x1] (!%p186_p10), %v1192_v39  ;;  %239 = vst [vmem:[%s1364_s26] sm:$0x1] (!%p186_p10), %v1192_v39  ;;  %s905_s27 = sshll.u32 (!%p186_p10), %s1182_s15, 4  ;;  %s733_s28 = sshll.u32 (!%p186_p10), %s1360_s23, 4  ;;  %s1427_s28 = int_to_ptr.vmem [resolvable:$true] %s733_s28 }
  0x14   : > { %1008 = vmatpush3.bf16.msra.mxu0 (!%p186_p10), %v1005_v3  ;;  %1016 = vmatpush3.bf16.msra.mxu1 (!%p186_p10), %v1005_v3  ;;  %s747_s29 = sshll.u32 (!%p186_p10), %s1364_s26, 4  ;;  %s1425_s5 = scalar_lea.hbm (!%p186_p10), %s1506_s2, %s905_s27  ;;  %s1435_s29 = int_to_ptr.vmem [resolvable:$true] %s747_s29 }
  0x15   : > { %1010 = vmatprep.subr.bf16.mxu0 (!%p186_p10), %v1009_v5  ;;  %1014 = vmatprep.subr.bf16.mxu1 (!%p186_p10), %v1009_v5  ;;  %s1080_s9 = scalar_lea.vmem (!%p186_p10), %s1427_s28, 16  ;;  %s1193_s10 = smov (!%p186_p10), [#allocation2]  }
  0x16   : > { %p1081_p12 = scmp.ne.s32.totalorder (!%p186_p10), %s1427_s28, %s1080_s9 }
  0x18   : > { %s222_s7 = scalar_select %p221_p11, %s1182_s15, 1  ;;  %1012 = vmatpush3.bf16.msra.mxu0 %v1009_v5  ;;  %1017 = vmatpush3.bf16.msra.mxu1 %v1009_v5 }
  0x19   : > { %955 = vmatprep.subr.msk.mxu0 %vm374_vm1, %v276_v6  ;;  %1015 = vmatprep.subr.msk.mxu1 %vm374_vm1, %v276_v6  ;;  %p1082_p13 = pnand %p1081_p12, %p1255_p4 }
  0x1a   : > { %s909_s8 = sshll.u32 %s222_s7, 8  ;;  %s1433_s7 = scalar_lea.hbm %s1507_s3, %s905_s27 }
  0x1b   : > { %s1287_s11 = scalar_lea.vmem %s1504_s0, %s909_s8  ;;  %s716_s8 = scalar_lea.sflag [#allocation3], %s1357_s21 }
  0x1c   : > { %v240_v7 = vld [vmem:[%s1287_s11] sm:$0xff]  ;;  %v241_v8 = vld [vmem:[%s1287_s11 + $0x8] sm:$0xff]  ;;  %v242_v9 = vld [vmem:[%s1287_s11 + $0x10] sm:$0xff]  ;;  %956 = vmatpush3.msk.msra.mxu0 %vm374_vm1, %v276_v6  ;;  %1018 = vmatpush3.msk.msra.mxu1 %vm374_vm1, %v276_v6  ;;  %p1083_p0 = pneg %p1082_p13 }
  0x1d   : > { %957 = vmatprep.mubr.msk.f32.mxu0 %vm277_vm0, %v240_v7  ;;  %v256_v10 = vld [vmem:[%s1287_s11 + $0x80] sm:$0xff]  ;;  %v257_v11 = vld [vmem:[%s1287_s11 + $0x88] sm:$0xff]  ;;  %v258_v12 = vld [vmem:[%s1287_s11 + $0x90] sm:$0xff] }
  0x1e   : > { %958 = vmatmul.mubr.msk.f32.vlgmr.msra.gmra.mrb[0].mxu0 %vm277_vm0, %v241_v8  ;;  %981 = vmatprep.mubr.msk.f32.mxu1 %vm277_vm0, %v256_v10  ;;  %v243_v13 = vld [vmem:[%s1287_s11 + $0x18] sm:$0xff]  ;;  %v244_v14 = vld [vmem:[%s1287_s11 + $0x20] sm:$0xff]  ;;  %v245_v17 = vld [vmem:[%s1287_s11 + $0x28] sm:$0xff] }
  0x1f   : > { %960 = vmatprep.mubr.msk.f32.mxu0 %vm277_vm0, %v242_v9  ;;  %982 = vmatmul.mubr.msk.f32.vlgmr.msra.gmra.mrb[0].mxu1 %vm277_vm0, %v257_v11  ;;  %v259_v15 = vld [vmem:[%s1287_s11 + $0x98] sm:$0xff]  ;;  %v260_v16 = vld [vmem:[%s1287_s11 + $0xa0] sm:$0xff]  ;;  %v246_v18 = vld [vmem:[%s1287_s11 + $0x30] sm:$0xff] }
  0x20   : > { %984 = vmatprep.mubr.msk.f32.mxu1 %vm277_vm0, %v258_v12  ;;  %v261_v19 = vld [vmem:[%s1287_s11 + $0xa8] sm:$0xff]  ;;  %v262_v20 = vld [vmem:[%s1287_s11 + $0xb0] sm:$0xff]  ;;  %v247_v21 = vld [vmem:[%s1287_s11 + $0x38] sm:$0xff] }
  0x21   : > { %v248_v22 = vld [vmem:[%s1287_s11 + $0x40] sm:$0xff]  ;;  %v263_v23 = vld [vmem:[%s1287_s11 + $0xb8] sm:$0xff]  ;;  %v249_v25 = vld [vmem:[%s1287_s11 + $0x48] sm:$0xff] }
  0x22   : > { %961 = vmatmul.mubr.msk.f32.gmra.mrb[2].mxu0 %vm277_vm0, %v243_v13  ;;  %v264_v24 = vld [vmem:[%s1287_s11 + $0xc0] sm:$0xff]  ;;  %v250_v26 = vld [vmem:[%s1287_s11 + $0x50] sm:$0xff]  ;;  %v265_v27 = vld [vmem:[%s1287_s11 + $0xc8] sm:$0xff] }
  0x23   : > { %963 = vmatprep.mubr.msk.f32.mxu0 %vm277_vm0, %v244_v14  ;;  %985 = vmatmul.mubr.msk.f32.gmra.mrb[2].mxu1 %vm277_vm0, %v259_v15  ;;  %v266_v28 = vld [vmem:[%s1287_s11 + $0xd0] sm:$0xff]  ;;  %v251_v29 = vld [vmem:[%s1287_s11 + $0x58] sm:$0xff]  ;;  %v252_v30 = vld [vmem:[%s1287_s11 + $0x60] sm:$0xff] }
  0x24   : > { %987 = vmatprep.mubr.msk.f32.mxu1 %vm277_vm0, %v260_v16  ;;  %v267_v31 = vld [vmem:[%s1287_s11 + $0xd8] sm:$0xff]  ;;  %v268_v32 = vld [vmem:[%s1287_s11 + $0xe0] sm:$0xff]  ;;  %v253_v33 = vld [vmem:[%s1287_s11 + $0x68] sm:$0xff] }
  0x25   : > { %v254_v34 = vld [vmem:[%s1287_s11 + $0x70] sm:$0xff]  ;;  %v269_v35 = vld [vmem:[%s1287_s11 + $0xe8] sm:$0xff]  ;;  %v255_v37 = vld [vmem:[%s1287_s11 + $0x78] sm:$0xff] }
  0x26   : > { %964 = vmatmul.mubr.msk.f32.gmra.mrb[4].mxu0 %vm277_vm0, %v245_v17  ;;  %v270_v36 = vld [vmem:[%s1287_s11 + $0xf0] sm:$0xff]  ;;  %v271_v38 = vld [vmem:[%s1287_s11 + $0xf8] sm:$0xff]  ;;  %s1084_s11 = sshll.u32 %s1193_s10, 4  ;;  %s1085_s11 = int_to_ptr.vmem [resolvable:$false] %s1084_s11 }
  0x27   : > { %966 = vmatprep.mubr.msk.f32.mxu0 %vm277_vm0, %v246_v18  ;;  %988 = vmatmul.mubr.msk.f32.gmra.mrb[4].mxu1 %vm277_vm0, %v261_v19  ;;  %s1086_s18 = scalar_lea.vmem %s1085_s11, 32  ;;  %p1087_p1 = scmp.lt.s32.totalorder %s1427_s28, %s1085_s11 }
  0x28   : > { %990 = vmatprep.mubr.msk.f32.mxu1 %vm277_vm0, %v262_v20  ;;  %p1088_p2 = scmp.lt.s32.totalorder %s1086_s18, %s1080_s9 }
  0x2a   : > { %967 = vmatmul.mubr.msk.f32.gmra.mrb[6].mxu0 %vm277_vm0, %v247_v21  ;;  %p1089_p3 = por %p1088_p2, %p1087_p1 }
  0x2b   : > { %969 = vmatprep.mubr.msk.f32.mxu0 %vm277_vm0, %v248_v22  ;;  %991 = vmatmul.mubr.msk.f32.gmra.mrb[6].mxu1 %vm277_vm0, %v263_v23 }
  0x2c   : > { %993 = vmatprep.mubr.msk.f32.mxu1 %vm277_vm0, %v264_v24  ;;  %p1090_p5 = pnand %p1089_p3, %p1083_p0 }
  0x2e   : > { %970 = vmatmul.mubr.msk.f32.gmra.mrb[8].mxu0 %vm277_vm0, %v249_v25 }
  0x2f   : > { %972 = vmatprep.mubr.msk.f32.mxu0 %vm277_vm0, %v250_v26  ;;  %994 = vmatmul.mubr.msk.f32.gmra.mrb[8].mxu1 %vm277_vm0, %v265_v27 }
  0x30   : > { %996 = vmatprep.mubr.msk.f32.mxu1 %vm277_vm0, %v266_v28 }
  0x32   : > { %973 = vmatmul.mubr.msk.f32.gmra.mrb[10].mxu0 %vm277_vm0, %v251_v29 }
  0x33   : > { %975 = vmatprep.mubr.msk.f32.mxu0 %vm277_vm0, %v252_v30  ;;  %997 = vmatmul.mubr.msk.f32.gmra.mrb[10].mxu1 %vm277_vm0, %v267_v31 }
  0x34   : > { %999 = vmatprep.mubr.msk.f32.mxu1 %vm277_vm0, %v268_v32 }
  0x36   : > { %976 = vmatmul.mubr.msk.f32.gmra.mrb[12].mxu0 %vm277_vm0, %v253_v33 }
  0x37   : > { %978 = vmatprep.mubr.msk.f32.mxu0 %vm277_vm0, %v254_v34  ;;  %1000 = vmatmul.mubr.msk.f32.gmra.mrb[12].mxu1 %vm277_vm0, %v269_v35 }
  0x38   : > { %1002 = vmatprep.mubr.msk.f32.mxu1 %vm277_vm0, %v270_v36 }
  0x3a   : > { %979 = vmatmul.mubr.msk.f32.gmra.mrb[14].mxu0 %vm277_vm0, %v255_v37 }
  0x3b   : > { %1003 = vmatmul.mubr.msk.f32.gmra.mrb[14].mxu1 %vm277_vm0, %v271_v38 }
  0xf1   : > { %v959_v40 = vpop.f32.mrb[0].mxu0 }
  0xf2   : > { %v645_v41 = vmul.f32 %v959_v40, %v959_v40  ;;  %v444_v42 = vpop.f32.mrb[1].mxu0  ;;  %v1367_v43 = vpop.f32.mrb[0].mxu1 }
  0xf3   : > { %v604_v44 = vadd.f32 %v959_v40, %v444_v42  ;;  %v644_v45 = vmul.f32 %v444_v42, %v444_v42  ;;  %v1369_v46 = vpop.f32.mrb[1].mxu1 }
  0xf5   : > { %v676_v47 = vadd.f32 %v645_v41, %v644_v45  ;;  %v962_v48 = vpop.f32.mrb[2].mxu0 }
  0xf6   : > { %v454_v49 = vpop.f32.mrb[3].mxu0  ;;  %v1371_v50 = vpop.f32.mrb[2].mxu1  ;;  %v647_v54 = vmul.f32 %v962_v48, %v962_v48 }
  0xf7   : > { %v605_v51 = vadd.f32 %v604_v44, %v454_v49  ;;  %v646_v52 = vmul.f32 %v454_v49, %v454_v49  ;;  %v1373_v53 = vpop.f32.mrb[3].mxu1 }
  0xf9   : > { %v677_v55 = vadd.f32 %v676_v47, %v646_v52  ;;  %v965_v56 = vpop.f32.mrb[4].mxu0  ;;  %v606_v57 = vadd.f32 %v962_v48, %v605_v51 }
  0xfa   : > { %v464_v58 = vpop.f32.mrb[5].mxu0  ;;  %v1375_v59 = vpop.f32.mrb[4].mxu1  ;;  %v649_v0 = vmul.f32 %v965_v56, %v965_v56 }
  0xfb   : > { %v607_v60 = vadd.f32 %v606_v57, %v464_v58  ;;  %v648_v61 = vmul.f32 %v464_v58, %v464_v58  ;;  %v678_v62 = vadd.f32 %v677_v55, %v647_v54  ;;  %v1377_v63 = vpop.f32.mrb[5].mxu1  ;;  %v660_v57 = vmul.f32 %v1369_v46, %v1369_v46 }
  0xfd   : > { %v679_v1 = vadd.f32 %v678_v62, %v648_v61  ;;  %v968_v2 = vpop.f32.mrb[6].mxu0  ;;  %v608_v3 = vadd.f32 %v965_v56, %v607_v60  ;;  %v661_v61 = vmul.f32 %v1367_v43, %v1367_v43 }
  0xfe   : > { %v474_v4 = vpop.f32.mrb[7].mxu0  ;;  %v1379_v5 = vpop.f32.mrb[6].mxu1  ;;  %v651_v10 = vmul.f32 %v968_v2, %v968_v2 }
  0xff   : > { %v609_v6 = vadd.f32 %v608_v3, %v474_v4  ;;  %v650_v7 = vmul.f32 %v474_v4, %v474_v4  ;;  %v680_v8 = vadd.f32 %v679_v1, %v649_v0  ;;  %v1381_v9 = vpop.f32.mrb[7].mxu1  ;;  %v662_v1 = vmul.f32 %v1373_v53, %v1373_v53 }
 0x100   : > { %v663_v4 = vmul.f32 %v1371_v50, %v1371_v50 }
 0x101   : > { %v681_v11 = vadd.f32 %v680_v8, %v650_v7  ;;  %v971_v12 = vpop.f32.mrb[8].mxu0  ;;  %v610_v13 = vadd.f32 %v968_v2, %v609_v6 }
 0x102   : > { %v484_v14 = vpop.f32.mrb[9].mxu0  ;;  %v1383_v15 = vpop.f32.mrb[8].mxu1  ;;  %v653_v20 = vmul.f32 %v971_v12, %v971_v12 }
 0x103   : > { %v611_v16 = vadd.f32 %v610_v13, %v484_v14  ;;  %v652_v17 = vmul.f32 %v484_v14, %v484_v14  ;;  %v682_v18 = vadd.f32 %v681_v11, %v651_v10  ;;  %v564_v19 = vpop.f32.mrb[9].mxu1 }
 0x105   : > { %v683_v21 = vadd.f32 %v682_v18, %v652_v17  ;;  %v974_v22 = vpop.f32.mrb[10].mxu0  ;;  %v612_v23 = vadd.f32 %v971_v12, %v611_v16 }
 0x106   : > { %v494_v24 = vpop.f32.mrb[11].mxu0  ;;  %v1385_v25 = vpop.f32.mrb[10].mxu1  ;;  %v655_v30 = vmul.f32 %v974_v22, %v974_v22 }
 0x107   : > { %v613_v26 = vadd.f32 %v612_v23, %v494_v24  ;;  %v654_v27 = vmul.f32 %v494_v24, %v494_v24  ;;  %v684_v28 = vadd.f32 %v683_v21, %v653_v20  ;;  %v574_v29 = vpop.f32.mrb[11].mxu1  ;;  %v669_v21 = vmul.f32 %v1383_v15, %v1383_v15 }
 0x108   : > { %v670_v23 = vmul.f32 %v574_v29, %v574_v29 }
 0x109   : > { %v685_v31 = vadd.f32 %v684_v28, %v654_v27  ;;  %v977_v32 = vpop.f32.mrb[12].mxu0  ;;  %v614_v33 = vadd.f32 %v974_v22, %v613_v26 }
 0x10a   : > { %v504_v34 = vpop.f32.mrb[13].mxu0  ;;  %v1001_v35 = vpop.f32.mrb[12].mxu1  ;;  %v657_v40 = vmul.f32 %v977_v32, %v977_v32 }
 0x10b   : > { %v615_v36 = vadd.f32 %v614_v33, %v504_v34  ;;  %v656_v37 = vmul.f32 %v504_v34, %v504_v34  ;;  %v686_v38 = vadd.f32 %v685_v31, %v655_v30  ;;  %v584_v39 = vpop.f32.mrb[13].mxu1 }
 0x10c   : > { %v672_v30 = vmul.f32 %v584_v39, %v584_v39 }
 0x10d   : > { %v687_v41 = vadd.f32 %v686_v38, %v656_v37  ;;  %v980_v42 = vpop.f32.mrb[14].mxu0  ;;  %v616_v44 = vadd.f32 %v977_v32, %v615_v36 }
 0x10e   : > { %v514_v45 = vpop.f32.mrb[15].mxu0  ;;  %v1004_v47 = vpop.f32.mrb[14].mxu1  ;;  %v659_v54 = vmul.f32 %v980_v42, %v980_v42 }
 0x10f   : > { %v617_v48 = vadd.f32 %v616_v44, %v514_v45  ;;  %v658_v49 = vmul.f32 %v514_v45, %v514_v45  ;;  %v688_v51 = vadd.f32 %v687_v41, %v657_v40  ;;  %v594_v52 = vpop.f32.mrb[15].mxu1 }
 0x110   : > { %v674_v34 = vmul.f32 %v594_v52, %v594_v52 }
 0x111   : > { %v618_v55 = vadd.f32 %v980_v42, %v617_v48  ;;  %v689_v56 = vadd.f32 %v688_v51, %v658_v49  ;;  %v603_v51 = vld [vmem:[%s1360_s23] sm:$0x1] }
 0x113   : > { %v690_v58 = vadd.f32 %v689_v56, %v659_v54  ;;  %v619_v60 = vadd.f32 %v618_v55, %v1369_v46  ;;  %v664_v46 = vmul.f32 %v1377_v63, %v1377_v63  ;;  %v643_v54 = vld [vmem:[%s1364_s26] sm:$0x1] }
 0x115   : > { %v691_v62 = vadd.f32 %v690_v58, %v660_v57  ;;  %v620_v0 = vadd.f32 %v1367_v43, %v619_v60  ;;  %v665_v43 = vmul.f32 %v1375_v59, %v1375_v59 }
 0x117   : > { %v621_v2 = vadd.f32 %v620_v0, %v1373_v53  ;;  %v692_v3 = vadd.f32 %v691_v62, %v661_v61  ;;  %v666_v53 = vmul.f32 %v1381_v9, %v1381_v9 }
 0x119   : > { %v693_v6 = vadd.f32 %v692_v3, %v662_v1  ;;  %v622_v7 = vadd.f32 %v1371_v50, %v621_v2  ;;  %v667_v50 = vmul.f32 %v1379_v5, %v1379_v5 }
 0x11b   : > { %v623_v8 = vadd.f32 %v622_v7, %v1377_v63  ;;  %v694_v10 = vadd.f32 %v693_v6, %v663_v4  ;;  %v668_v63 = vmul.f32 %v564_v19, %v564_v19 }
 0x11d   : > { %v695_v11 = vadd.f32 %v694_v10, %v664_v46  ;;  %v624_v12 = vadd.f32 %v1375_v59, %v623_v8 }
 0x11f   : > { %v625_v13 = vadd.f32 %v624_v12, %v1381_v9  ;;  %v696_v14 = vadd.f32 %v695_v11, %v665_v43  ;;  %v671_v9 = vmul.f32 %v1385_v25, %v1385_v25 }
 0x121   : > { %v697_v16 = vadd.f32 %v696_v14, %v666_v53  ;;  %v626_v17 = vadd.f32 %v1379_v5, %v625_v13 }
 0x123   : > { %v627_v18 = vadd.f32 %v626_v17, %v564_v19  ;;  %v698_v20 = vadd.f32 %v697_v16, %v667_v50  ;;  %v673_v19 = vmul.f32 %v1001_v35, %v1001_v35 }
 0x125   : > { %v699_v22 = vadd.f32 %v698_v20, %v668_v63  ;;  %v628_v59 = vadd.f32 %v1383_v15, %v627_v18 }
 0x127   : > { %v629_v24 = vadd.f32 %v628_v59, %v574_v29  ;;  %v700_v26 = vadd.f32 %v699_v22, %v669_v21  ;;  %v675_v29 = vmul.f32 %v1004_v47, %v1004_v47 }
 0x129   : > { %v701_v27 = vadd.f32 %v700_v26, %v670_v23  ;;  %v630_v28 = vadd.f32 %v1385_v25, %v629_v24 }
 0x12b   : > { %v631_v5 = vadd.f32 %v630_v28, %v584_v39  ;;  %v702_v31 = vadd.f32 %v701_v27, %v671_v9 }
 0x12d   : > { %v703_v32 = vadd.f32 %v702_v31, %v672_v30  ;;  %v632_v33 = vadd.f32 %v1001_v35, %v631_v5 }
 0x12f   : > { %v633_v36 = vadd.f32 %v632_v33, %v594_v52  ;;  %v704_v15 = vadd.f32 %v703_v32, %v673_v19 }
 0x131   : > { %v634_v37 = vadd.f32 %v1004_v47, %v633_v36  ;;  %v705_v38 = vadd.f32 %v704_v15, %v674_v34 }
 0x133   : > { %v635_v40 = vrot.slane %v634_v37, 4  ;;  %v706_v41 = vadd.f32 %v705_v38, %v675_v29 }
 0x135   : > { %v636_v25 = vadd.f32 %v635_v40, %v634_v37  ;;  %v707_v42 = vrot.slane %v706_v41, 4 }
 0x137   : > { %v637_v39 = vrot.slane %v636_v25, 2  ;;  %v708_v44 = vadd.f32 %v707_v42, %v706_v41 }
 0x139   : > { %v638_v45 = vadd.f32 %v637_v39, %v636_v25  ;;  %v709_v35 = vrot.slane %v708_v44, 2 }
 0x13b   : > { %v639_v48 = vrot.slane %v638_v45, 1  ;;  %v710_v49 = vadd.f32 %v709_v35, %v708_v44 }
 0x13d   : > { %v640_v47 = vadd.f32 %v639_v48, %v638_v45  ;;  %v711_v52 = vrot.slane %v710_v49, 1 }
 0x13f   : > { %v641_v55 = vadd.f32 %v640_v47, %v603_v51  ;;  %v712_v56 = vadd.f32 %v711_v52, %v710_v49 }
 0x141   : > { %642 = vst [vmem:[%s1360_s23] sm:$0x1] %v641_v55  ;;  %v713_v57 = vadd.f32 %v712_v56, %v643_v54 }
 0x142   : > { %1093 = shalt.err (!%p1090_p5)
}
 0x143   : > { %s1094_s19 = scalar_lea.hbm %s1425_s5, 16  ;;  %s1098_s30 = scalar_lea.hbm %s1506_s2, 32 }
 0x144   : > { %p1095_p6 = scmp.ne.s32.totalorder %s1425_s5, %s1094_s19  ;;  %p1099_p10 = scmp.lt.u32.totalorder %s1425_s5, %s1506_s2 }
 0x145   : > { %p1100_p11 = scmp.lt.u32.totalorder %s1098_s30, %s1094_s19  ;;  %p1102_p13 = scmp.lt.u32.totalorder %s1094_s19, %s1425_s5 }
 0x146   : > { %p1096_p7 = pnand %p1095_p6, %p1255_p4 }
 0x147   : > { %p1101_p12 = por %p1100_p11, %p1099_p10 }
 0x148   : > { %p1097_p9 = pneg %p1096_p7 }
 0x149   : > { %p1103_p0 = por %p1102_p13, %p1101_p12 }
 0x14b   : > { %p1104_p1 = pnand %p1103_p0, %p1097_p9 }
 0x14d   : > { %1107 = shalt.err (!%p1104_p1)
}
 0x14e   : > { %1019 = dma.vmem_to_hbm [thread:$0]  (%p1255_p4), %s1427_s28, 16, %s1425_s5, %s716_s8   ;;  %714 = vst [vmem:[%s1364_s26] sm:$0x1] %v713_v57 }
 0x14f   : > { %s720_s6 = scalar_lea.sflag [#allocation5], %s1357_s21  ;;  %s1108_s9 = scalar_lea.vmem %s1435_s29, 16 }
 0x150   : > { %p1109_p2 = scmp.ne.s32.totalorder %s1435_s29, %s1108_s9  ;;  %s1194_s10 = smov [#allocation4]  }
 0x151   : > { %s1112_s11 = sshll.u32 %s1194_s10, 4  ;;  %s1113_s11 = int_to_ptr.vmem [resolvable:$false] %s1112_s11 }
 0x152   : > { %p1110_p3 = pnand %p1109_p2, %p1255_p4  ;;  %s1114_s18 = scalar_lea.vmem %s1113_s11, 32 }
 0x153   : > { %p1115_p6 = scmp.lt.s32.totalorder %s1435_s29, %s1113_s11  ;;  %p1116_p7 = scmp.lt.s32.totalorder %s1114_s18, %s1108_s9 }
 0x154   : > { %p1111_p5 = pneg %p1110_p3 }
 0x155   : > { %p1117_p9 = por %p1116_p7, %p1115_p6 }
 0x157   : > { %p1118_p10 = pnand %p1117_p9, %p1111_p5 }
 0x159   : > { %1121 = shalt.err (!%p1118_p10)
}
 0x15a   : > { %s1122_s21 = scalar_lea.hbm %s1433_s7, 16  ;;  %s1126_s5 = scalar_lea.hbm %s1507_s3, 32 }
 0x15b   : > { %p1123_p11 = scmp.ne.s32.totalorder %s1433_s7, %s1122_s21  ;;  %p1127_p0 = scmp.lt.u32.totalorder %s1433_s7, %s1507_s3 }
 0x15c   : > { %p1128_p1 = scmp.lt.u32.totalorder %s1126_s5, %s1122_s21  ;;  %p1130_p3 = scmp.lt.u32.totalorder %s1122_s21, %s1433_s7 }
 0x15d   : > { %p1124_p12 = pnand %p1123_p11, %p1255_p4 }
 0x15e   : > { %p1129_p2 = por %p1128_p1, %p1127_p0 }
 0x15f   : > { %p1125_p13 = pneg %p1124_p12 }
 0x160   : > { %p1131_p5 = por %p1130_p3, %p1129_p2 }
 0x162   : > { %p1132_p6 = pnand %p1131_p5, %p1125_p13 }
 0x164   : > { %1135 = shalt.err (!%p1132_p6)
}
 0x165   : > { %1020 = dma.vmem_to_hbm [thread:$0]  (%p1255_p4), %s1435_s29, 16, %s1433_s7, %s720_s6  }
 0x166 PF: > { %p1030_p7 = scmp.ge.s32.totalorder %s1190_s17, 2  ;;  %s759_s23 = sand.u32 1, %s1170_s12  }
 0x167   : > { %s760_s27 = scalar_lea.sflag [#allocation3], %s759_s23 }
 0x168   : > { %p1024_p9 = pnand %p1030_p7, %p1262_p8 }
 0x16a   : > { %1161 = dma.done.wait (!%p1024_p9), %s760_s27, 16  }
 0x16b   : > { %1163 = vsyncadd (!%p1024_p9), %s760_s27, 4294967280  ;;  %s768_s30 = scalar_lea.sflag [#allocation5], %s759_s23 }
 0x16c   : > { %1165 = dma.done.wait (!%p1024_p9), %s768_s30, 16  }
 0x16d   : > { %1167 = vsyncadd (!%p1024_p9), %s768_s30, 4294967280  ;;  %s20_s17 = sadd.s32 1, %s1190_s17   ;;  %s1510_s12 = smov %s1174_s13 }
 0x16e   : > { %p17_p10 = scmp.ge.s32.totalorder %s20_s17, 4   ;;  %s1511_s13 = smov %s1178_s14 }
 0x16f   : > { %s1512_s14 = smov %s1268_s25  ;;  %s1513_s15 = smov %s1186_s16 }
 0x170   : > { %s1514_s16 = smov %s1516_s20  ;;  %19 = sbr.rel (!%p17_p10) target bundleno = 6 (0x6), region = 87 }
 0x177   :  { %772 = vsyncpa [#allocation3], 1 }
 0x178   :  { %774 = vsyncpa [#allocation3 + $0x1], 1 }
 0x179   :  { %775 = vsyncpa [#allocation5], 1 }
 0x17a   :  { %777 = vsyncpa [#allocation5 + $0x1], 1 }

</bundles_post_ra>
